<compile_context>
chip_gen: v5e
topology: v5e:2x2
jax: 0.10.0
libtpu: 0.0.40
codegen_flags: <defaults>
</compile_context>

<pallas_src>
import functools

import jax
import jax.numpy as jnp
from jax.experimental import pallas as pl
from jax.experimental.pallas import tpu as pltpu


def _conv_bn_relu_kernel(x_ref, w_ref, b_ref, o_ref, *, apply_relu):
    # x_ref: (Cin, TS)   spatial-column tile of one image (NCHW, channels on K)
    # w_ref: (Cout, Cin) BN-folded 1x1 conv weight (VMEM-resident, constant map)
    # b_ref: (Cout, 1)   BN-folded per-channel shift (f32)
    # o_ref: (Cout, TS)  lane-dense output tile (last dim multiple of 128)
    acc = jnp.dot(w_ref[...], x_ref[...], preferred_element_type=jnp.float32)
    acc = acc + b_ref[...]
    if apply_relu:
        acc = jnp.maximum(acc, 0.0)
    o_ref[...] = acc.astype(o_ref.dtype)


def _pick_spatial_tile(s, ts_max):
    """Largest lane-dense tile (multiple of 128) that divides s, capped at ts_max."""
    if s <= ts_max or s % 128 != 0:
        return s
    ts = (ts_max // 128) * 128
    while ts >= 128:
        if s % ts == 0:
            return ts
        ts -= 128
    return s


def conv_bn_relu(x_nchw, conv_w, conv_b, bn_gamma, bn_beta, bn_mean, bn_var,
                 *, bn_eps=1e-5, has_bn=True, has_relu=True, ts_max=2048):
    """ConvBnRelu forward (ksize=1, stride=1, pad=0, groups=1; BN in eval mode).

    x_nchw: [N, Cin, H, W]; conv_w: [Cout, Cin, 1, 1] (PyTorch layout);
    conv_b: [Cout] or None; bn_*: [Cout].  Returns [N, Cout, H, W].
    """
    N, Cin, H, W = x_nchw.shape
    Cout = conv_w.shape[0]

    w2d = conv_w.reshape(Cout, Cin).astype(jnp.float32)
    bias = (jnp.zeros((Cout,), jnp.float32) if conv_b is None
            else conv_b.astype(jnp.float32))

    if has_bn:
        scale = bn_gamma.astype(jnp.float32) * jax.lax.rsqrt(
            bn_var.astype(jnp.float32) + bn_eps)
        w_fold = w2d * scale[:, None]
        b_fold = (bias - bn_mean.astype(jnp.float32)) * scale + bn_beta.astype(jnp.float32)
    else:
        w_fold, b_fold = w2d, bias

    w_fold = w_fold.astype(x_nchw.dtype)   # bf16 inputs -> bf16 MXU operands
    b_fold = b_fold.reshape(Cout, 1)       # keep the shift in f32

    S = H * W
    TS = _pick_spatial_tile(S, ts_max)
    x3 = x_nchw.reshape(N, Cin, S)         # free reshape, no transpose

    out3 = pl.pallas_call(
        functools.partial(_conv_bn_relu_kernel, apply_relu=has_relu),
        out_shape=jax.ShapeDtypeStruct((N, Cout, S), x_nchw.dtype),
        grid=(N, S // TS),
        in_specs=[
            pl.BlockSpec((None, Cin, TS), lambda n, s: (n, 0, s)),   # x tile
            pl.BlockSpec((Cout, Cin), lambda n, s: (0, 0)),          # weight (resident)
            pl.BlockSpec((Cout, 1), lambda n, s: (0, 0)),            # shift (resident)
        ],
        out_specs=pl.BlockSpec((None, Cout, TS), lambda n, s: (n, 0, s)),
        compiler_params=pltpu.CompilerParams(
            dimension_semantics=("parallel", "parallel")),
    )(x3, w_fold, b_fold)

    return out3.reshape(N, Cout, H, W)


def conv_bn_relu_reference(x_nchw, conv_w, conv_b, bn_gamma, bn_beta, bn_mean,
                           bn_var, *, bn_eps=1e-5, has_bn=True, has_relu=True):
    Cout, Cin = conv_w.shape[0], conv_w.shape[1]
    w2d = conv_w.reshape(Cout, Cin)
    y = jnp.einsum('nchw,oc->nohw', x_nchw, w2d)
    if conv_b is not None:
        y = y + conv_b[None, :, None, None]
    if has_bn:
        inv = bn_gamma / jnp.sqrt(bn_var + bn_eps)
        y = (y - bn_mean[None, :, None, None]) * inv[None, :, None, None] \
            + bn_beta[None, :, None, None]
    if has_relu:
        y = jnp.maximum(y, 0.0)
    return y


if __name__ == "__main__":
    # Small shapes consistent with the module: batch=2, Cin=32, Cout=16, 16x16.
    N, Cin, Cout, H, W = 2, 32, 16, 16, 16

    key = jax.random.PRNGKey(0)
    kx, kw, kg, kb, km, kv = jax.random.split(key, 6)
    x = jax.random.normal(kx, (N, Cin, H, W), dtype=jnp.float32)
    conv_w = jax.random.normal(kw, (Cout, Cin, 1, 1), dtype=jnp.float32) * 0.1
    conv_b = None  # ConvBnRelu default: has_bias=False
    bn_gamma = 1.0 + 0.1 * jax.random.normal(kg, (Cout,), dtype=jnp.float32)
    bn_beta = 0.1 * jax.random.normal(kb, (Cout,), dtype=jnp.float32)
    bn_mean = 0.1 * jax.random.normal(km, (Cout,), dtype=jnp.float32)
    bn_var = jnp.abs(jax.random.normal(kv, (Cout,), dtype=jnp.float32)) + 0.5

    out = jax.block_until_ready(
        conv_bn_relu(x, conv_w, conv_b, bn_gamma, bn_beta, bn_mean, bn_var))
    ref = jax.block_until_ready(
        conv_bn_relu_reference(x, conv_w, conv_b, bn_gamma, bn_beta, bn_mean, bn_var))

    assert out.shape == (N, Cout, H, W)
    assert jnp.allclose(out, ref, atol=1e-4, rtol=1e-4)
    print("KERNEL_OK")
</pallas_src>

<mosaic_0001>
module attributes {stable_mosaic.version = 11 : i64} {
  func.func @_conv_bn_relu_kernel(%arg0: i32, %arg1: i32, %arg2: memref<1x32x256xf32, #tpu.memory_space<vmem>>, %arg3: memref<16x32xf32, #tpu.memory_space<vmem>>, %arg4: memref<16x1xf32, #tpu.memory_space<vmem>>, %arg5: memref<1x16x256xf32, #tpu.memory_space<vmem>>) attributes {dimension_semantics = [#tpu.dimension_semantics<parallel>, #tpu.dimension_semantics<parallel>], iteration_bounds = array<i64: 2, 1>, scalar_prefetch = 0 : i64, scratch_operands = 0 : i64, tpu.core_type = #tpu.core_type<tc>, window_params = [{transform_indices = @transform_0, window_bounds = array<i64: 1, 32, 256>}, {pipeline_mode = #tpu.pipeline_mode<synchronous>, transform_indices = @transform_1, window_bounds = array<i64: 16, 32>}, {pipeline_mode = #tpu.pipeline_mode<synchronous>, transform_indices = @transform_2, window_bounds = array<i64: 16, 1>}, {transform_indices = @transform_3, window_bounds = array<i64: 1, 16, 256>}]} {
    %c0 = arith.constant 0 : index
    %c0_0 = arith.constant 0 : index
    %0 = vector.load %arg3[%c0, %c0_0] : memref<16x32xf32, #tpu.memory_space<vmem>>, vector<16x32xf32>
    %c0_1 = arith.constant 0 : index
    %c0_2 = arith.constant 0 : index
    %c0_3 = arith.constant 0 : index
    %1 = vector.load %arg2[%c0_1, %c0_2, %c0_3] : memref<1x32x256xf32, #tpu.memory_space<vmem>>, vector<1x32x256xf32>
    %2 = vector.shape_cast %1 : vector<1x32x256xf32> to vector<32x256xf32>
    %cst = arith.constant dense<0.000000e+00> : vector<16x256xf32>
    %3 = tpu.matmul %0, %2, %cst {dimension_numbers = #tpu.dot_dimension_numbers<[1], [0], [0], [1], [0, 0, 1, 1], [], []>} : vector<16x32xf32>, vector<32x256xf32>, vector<16x256xf32> -> vector<16x256xf32>
    %c0_4 = arith.constant 0 : index
    %c0_5 = arith.constant 0 : index
    %4 = vector.load %arg4[%c0_4, %c0_5] : memref<16x1xf32, #tpu.memory_space<vmem>>, vector<16x1xf32>
    %5 = vector.broadcast %4 : vector<16x1xf32> to vector<16x256xf32>
    %6 = arith.addf %3, %5 : vector<16x256xf32>
    %cst_6 = arith.constant 0.000000e+00 : f32
    %7 = vector.broadcast %cst_6 : f32 to vector<16x256xf32>
    %8 = arith.maximumf %6, %7 : vector<16x256xf32>
    %c0_7 = arith.constant 0 : index
    %c0_8 = arith.constant 0 : index
    %c0_9 = arith.constant 0 : index
    %9 = vector.load %arg5[%c0_7, %c0_8, %c0_9] : memref<1x16x256xf32, #tpu.memory_space<vmem>>, vector<1x16x256xf32>
    %10 = vector.shape_cast %9 : vector<1x16x256xf32> to vector<16x256xf32>
    %11 = vector.shape_cast %8 : vector<16x256xf32> to vector<1x16x256xf32>
    tpu.vector_store %arg5[%c0_7, %c0_8, %c0_9], %11 {strides = array<i32>} : memref<1x16x256xf32, #tpu.memory_space<vmem>>, vector<1x16x256xf32>,
    return
  }
  func.func @transform_0(%arg0: i32, %arg1: i32) -> (i32, i32, i32) {
    %c0_i32 = arith.constant 0 : i32
    %c0_i32_0 = arith.constant 0 : i32
    return %arg0, %c0_i32, %arg1 : i32, i32, i32
  }
  func.func @transform_1(%arg0: i32, %arg1: i32) -> (i32, i32) {
    %c0_i32 = arith.constant 0 : i32
    %c0_i32_0 = arith.constant 0 : i32
    %c0_i32_1 = arith.constant 0 : i32
    return %c0_i32, %c0_i32_0 : i32, i32
  }
  func.func @transform_2(%arg0: i32, %arg1: i32) -> (i32, i32) {
    %c0_i32 = arith.constant 0 : i32
    %c0_i32_0 = arith.constant 0 : i32
    %c0_i32_1 = arith.constant 0 : i32
    return %c0_i32, %c0_i32_0 : i32, i32
  }
  func.func @transform_3(%arg0: i32, %arg1: i32) -> (i32, i32, i32) {
    %c0_i32 = arith.constant 0 : i32
    %c0_i32_0 = arith.constant 0 : i32
    return %arg0, %c0_i32, %arg1 : i32, i32, i32
  }
}

</mosaic_0001>

<bundles_post_ra>
// kernel: tpu_custom_call.1
= control target key start
LH: loop header
LB: loop body
LE: loop exit
PB: predicated region body
PF: predicated region fallthrough
CT: control target
= control target key end

     0   :  { %8 = vsyncpa [#allocation3], 0  ;;  %s768_s0 = inlined_call_operand.hbm [shape: f32[2,32,256], index: 0, kind: input, shape index: {}]   ;;  %s769_s1 = inlined_call_operand.vmem [shape: f32[16,32], index: 1, kind: input, shape index: {}]   ;;  %s770_s2 = inlined_call_operand.vmem [shape: f32[16,1], index: 2, kind: input, shape index: {}]   ;;  %s771_s3 = inlined_call_operand.hbm [shape: f32[2,16,256], index: 3, kind: output, shape index: {}]  }
   0x1   :  { %10 = vsyncpa [#allocation3 + $0x1], 0 }
   0x2   :  { %11 = vsyncpa [#allocation4], 0 }
   0x3   :  { %13 = vsyncpa [#allocation4 + $0x1], 0  ;;  %s635_s12 = smov 0   ;;  %s637_s13 = smov 0  }
   0x4   :  { %s639_s14 = smov 0   ;;  %s641_s15 = smov 0  }
   0x5   :  { %s643_s16 = smov 0   ;;  %s645_s17 = smov 0  }
   0x6 LB: > { %s399_s18 = sadd.s32 4294967295, %s608_s17   ;;  %s400_s19 = sadd.s32 4294967294, %s608_s17   ;;  %s608_s17 = sphi %s645_s17, %s19_s17   ;;  %s604_s16 = sphi %s643_s16, %s780_s16   ;;  %s600_s15 = sphi %s641_s15, %s779_s15   ;;  %s596_s14 = sphi %s639_s14, %s778_s14   ;;  %s592_s13 = sphi %s637_s13, %s777_s13   ;;  %s588_s12 = sphi %s635_s12, %s776_s12  }
   0x7   : > { %s31_s20 = sadd.s32 1, %s604_s16  ;;  %s40_s21 = sadd.s32 1, %s596_s14 }
   0x8   : > { %p33_p0 = scmp.ge.s32.totalorder %s31_s20, 2  ;;  %p47_p1 = scmp.ne.s32.totalorder %s596_s14, %s592_s13 }
   0x9   : > { %p48_p2 = scmp.eq.s32.totalorder %s608_s17, 0  ;;  %p53_p3 = scmp.ne.s32.totalorder %s592_s13, %s588_s12 }
   0xa   : > { %s782_s20 = smov (%p33_p0, %s31_s20), 0  ;;  %p54_p5 = scmp.eq.s32.totalorder %s399_s18, 0 }
   0xb   : > { %p676_p4 = por %p48_p2, %p47_p1  ;;  %s35_s23 = ssub.s32 %s604_s16, %s782_s20 }
   0xc   : > { %p121_p6 = scmp.eq.s32.totalorder %s399_s18, 1  ;;  %p38_p7 = scmp.eq.s32.totalorder %s35_s23, 0 }
   0xd   : > { %p682_p8 = por %p54_p5, %p53_p3  ;;  %p127_p10 = scmp.eq.s32.totalorder %s400_s19, 1 }
   0xe   : > { %p686_p9 = por %p121_p6, %p47_p1  ;;  %p402_p12 = scmp.ge.s32.totalorder %s608_s17, 2 }
   0xf   : > { %s691_s26 = scalar_select %p38_p7, %s596_s14, %s40_s21  }
  0x10   : > { %p693_p11 = por %p127_p10, %p53_p3  ;;  %p440_p13 = scmp.lt.s32.totalorder %s608_s17, 2 }
  0x11   : > { %s153_s28 = sand.u32 1, %s596_s14   ;;  %s418_s30 = sshll.u32 %s604_s16, 6 }
  0x12   : > { %s403_s29 = sshll.u32 %s153_s28, 6  ;;  %s164_s6 = scalar_lea.hbm %s768_s0, %s418_s30 }
  0x13   : > { %s157_s7 = scalar_lea.vmem [#allocation2], %s403_s29  ;;  %s165_s9 = sshll.u32 %s164_s6, 4  ;;  %s166_s9 = int_to_ptr.hbm [resolvable:$true] %s165_s9 }
  0x14   : > { %s167_s8 = sshll.u32 %s157_s7, 4  ;;  %p433_p0 = pnand %p440_p13, %p676_p4  ;;  %s168_s8 = int_to_ptr.vmem [resolvable:$true] %s167_s8 }
  0x15   : > { %p406_p1 = scmp.ge.s32.totalorder %s608_s17, 1  ;;  %s154_s10 = scalar_lea.sflag [#allocation3], %s153_s28 }
  0x16   : > { %s610_s11 = smov 256   ;;  %s611_s18 = smov 16  }
  0x17   : > { %435 = dma.hbm_to_vmem [thread:$0]  (!%p433_p0), %s166_s9, 1024, %s168_s8, %s154_s10, %s610_s11, %s610_s11, %s611_s18  }
  0x18   : > { %p175_p2 = scmp.lt.s32.totalorder %s608_s17, 3 }
  0x1a   : > { %p176_p3 = pnand %p406_p1, %p175_p2 }
  0x1b   : > { %s709_s19 = sand.u32 (!%p176_p3), 1, %s592_s13  }
  0x1c   : > { %179 = sbr.rel (%p176_p3) target bundleno = 185 (0xb9), region = 32  ;;  %s407_s21 = sshll.u32 (!%p176_p3), %s709_s19, 6 }
  0x1d   : > { %s182_s23 = scalar_lea.sflag (!%p176_p3), [#allocation3], %s709_s19  ;;  %s185_s29 = scalar_lea.vmem (!%p176_p3), [#allocation2], %s407_s21 }
  0x21   : > { %579 = dma.done.wait (%p682_p8), %s182_s23, 1024  }
  0x22   : > { %581 = vsyncadd (%p682_p8), %s182_s23, 4294966272  ;;  %v612_v0 = vmov 0   ;;  %v219_v1 = vld [vmem:[%s185_s29 + $0x30] sm:$0xff]  ;;  %v220_v2 = vld [vmem:[%s185_s29 + $0x38] sm:$0xff]  ;;  %vm233_vm0 = vcmask 261120   ;;  %s408_s8 = sshll.u32 %s709_s19, 5 }
  0x23   : > { %495 = vset.pattern.permute.xlu0 %v612_v0  ;;  %v217_v3 = vld [vmem:[%s185_s29 + $0x20] sm:$0xff]  ;;  %252 = vmatpush.msra.mxu0 %v219_v1  ;;  %v218_v4 = vld [vmem:[%s185_s29 + $0x28] sm:$0xff]  ;;  %v215_v5 = vld [vmem:[%s185_s29 + $0x10] sm:$0xff]  ;;  %s419_s9 = sshll.u32 %s600_s15, 5  ;;  %s208_s21 = scalar_lea.vmem [#allocation5], %s408_s8 }
  0x24   : > { %420 = vmatpush.msra.mxu2 %v219_v1  ;;  %275 = vmatpush.msra.mxu1 %v220_v2  ;;  %v216_v6 = vld [vmem:[%s185_s29 + $0x18] sm:$0xff]  ;;  %v213_v7 = vld [vmem:[%s185_s29] sm:$0xff]  ;;  %v214_v8 = vld [vmem:[%s185_s29 + $0x8] sm:$0xff]  ;;  %s308_s18 = scalar_lea.hbm %s771_s3, %s419_s9  ;;  %s309_s23 = sshll.u32 %s208_s21, 4  ;;  %s310_s23 = int_to_ptr.vmem [resolvable:$true] %s309_s23 }
  0x25   : > { %424 = vmatpush.msra.mxu3 %v220_v2  ;;  %253 = vmatpush.msra.mxu0 %v217_v3  ;;  %v211_v9 = vld [vmem:[%s769_s1] sm:$0xff]  ;;  %v212_v10 = vld [vmem:[%s769_s1 + $0x8] sm:$0xff]  ;;  %s311_s29 = sshll.u32 %s308_s18, 4  ;;  %s295_s15 = scalar_lea.sflag [#allocation4], %s709_s19  ;;  %s312_s29 = int_to_ptr.hbm [resolvable:$true] %s311_s29 }
  0x26   : > { %421 = vmatpush.msra.mxu2 %v217_v3  ;;  %276 = vmatpush.msra.mxu1 %v218_v4  ;;  %v221_v11 = vld [vmem:[%s770_s2] sm:$0xff]  ;;  %v222_v12 = vld [vmem:[%s770_s2 + $0x8] sm:$0xff]  ;;  %s540_s22 = sshra.s32 %s312_s29, 4  ;;  %s546_s4 = scalar_lea.hbm %s771_s3, 64  ;;  %s541_s22 = int_to_ptr.hbm [resolvable:$true] %s540_s22 }
  0x27   : > { %425 = vmatpush.msra.mxu3 %v218_v4  ;;  %254 = vmatpush.msra.mxu0 %v215_v5  ;;  %s542_s24 = scalar_lea.hbm %s541_s22, 32  ;;  %p547_p7 = scmp.lt.s32.totalorder %s541_s22, %s771_s3 }
  0x28   : > { %422 = vmatpush.msra.mxu2 %v215_v5  ;;  %277 = vmatpush.msra.mxu1 %v216_v6  ;;  %p543_p4 = scmp.ne.s32.totalorder %s541_s22, %s542_s24  ;;  %p548_p8 = scmp.lt.s32.totalorder %s546_s4, %s542_s24 }
  0x29   : > { %426 = vmatpush.msra.mxu3 %v216_v6  ;;  %255 = vmatpush.msra.mxu0 %v213_v7 }
  0x2a   : > { %423 = vmatpush.msra.mxu2 %v213_v7  ;;  %278 = vmatpush.msra.mxu1 %v214_v8  ;;  %p544_p5 = pnand %p543_p4, %p686_p9  ;;  %p549_p10 = por %p548_p8, %p547_p7 }
  0x2b   : > { %427 = vmatpush.msra.mxu3 %v214_v8  ;;  %409 = vmatmul.msk.f32.vlgmr.msra.gmra.mxu0 %vm233_vm0, %v211_v9 }
  0x2c   : > { %410 = vmatmul.msk.f32.vlgmr.msra.gmra.mxu2 %vm233_vm0, %v212_v10  ;;  %411 = vmatmul.msk.f32.vlgmr.msra.gmra.mxu1 %vm233_vm0, %v211_v9  ;;  %p545_p6 = pneg %p544_p5 }
  0x2d   : > { %412 = vmatmul.msk.f32.vlgmr.msra.gmra.mxu3 %vm233_vm0, %v212_v10  ;;  %225 = vperm.xlu0 %495, %v221_v11  }
  0x2e   : > { %p550_p13 = pnand %p549_p10, %p545_p6 }
  0x35   : > { %230 = vperm.xlu0 %495, %v222_v12  }
  0x9f   : > { %v226_v13 = vpop.permute.xlu0 %225 }
  0xa7   : > { %v231_v20 = vpop.permute.xlu0 %230 }
  0xa8   : > { %v257_v14 = vpop.f32.mrf.mxu0 }
  0xa9   : > { %v258_v15 = vadd.f32 %v257_v14, %v226_v13  ;;  %v280_v16 = vpop.f32.mrf.mxu1 }
  0xaa   : > { %v281_v17 = vadd.f32 %v280_v16, %v226_v13 }
  0xab   : > { %v286_v18 = vmax.f32 %v258_v15, 0.0 }
  0xac   : > { %v287_v19 = vmax.f32 %v281_v17, 0.0 }
  0xad   : > { %290 = vst [vmem:[%s208_s21] sm:$0xff] %v286_v18 }
  0xae   : > { %291 = vst [vmem:[%s208_s21 + $0x8] sm:$0xff] %v287_v19 }
  0xaf   : > { %v260_v21 = vpop.f32.mrf.mxu2 }
  0xb0   : > { %v261_v22 = vadd.f32 %v260_v21, %v231_v20  ;;  %v283_v23 = vpop.f32.mrf.mxu3 }
  0xb1   : > { %v284_v24 = vadd.f32 %v283_v23, %v231_v20 }
  0xb2   : > { %v288_v25 = vmax.f32 %v261_v22, 0.0 }
  0xb3   : > { %v289_v26 = vmax.f32 %v284_v24, 0.0 }
  0xb4   : > { %292 = vst [vmem:[%s208_s21 + $0x10] sm:$0xff] %v288_v25 }
  0xb5   : > { %293 = vst [vmem:[%s208_s21 + $0x18] sm:$0xff] %v289_v26 }
  0xb6   : > { %553 = shalt.err (!%p550_p13)
}
  0xb7   : > { %s613_s19 = smov 256   ;;  %s614_s7 = smov 16  }
  0xb8   : > { %430 = dma.vmem_to_hbm [thread:$0]  (%p686_p9), %s310_s23, 512, %s312_s29, %s295_s15, %s613_s19, %s613_s19, %s614_s7  }
  0xb9 PF: > { %s326_s8 = sand.u32 1, %s588_s12   ;;  %p437_p0 = pnand %p402_p12, %p693_p11 }
  0xba   : > { %s327_s9 = scalar_lea.sflag [#allocation4], %s326_s8 }
  0xbb   : > { %p438_p1 = pneg %p437_p0 }
  0xbd   : > { %583 = dma.done.wait (%p438_p1), %s327_s9, 512  }
  0xbe   : > { %585 = vsyncadd (%p438_p1), %s327_s9, 4294966784  ;;  %s19_s17 = sadd.s32 1, %s608_s17   ;;  %s776_s12 = smov %s592_s13 }
  0xbf   : > { %p16_p2 = scmp.ge.s32.totalorder %s19_s17, 4   ;;  %s777_s13 = smov %s596_s14 }
  0xc0   : > { %s778_s14 = smov %s691_s26  ;;  %s779_s15 = smov %s604_s16 }
  0xc1   : > { %s780_s16 = smov %s782_s20  ;;  %18 = sbr.rel (!%p16_p2) target bundleno = 6 (0x6), region = 77 }
  0xc6   :  { %333 = vsyncpa [#allocation3], 1 }
  0xc7   :  { %335 = vsyncpa [#allocation3 + $0x1], 1 }
  0xc8   :  { %336 = vsyncpa [#allocation4], 1 }
  0xc9   :  { %338 = vsyncpa [#allocation4 + $0x1], 1 }

</bundles_post_ra>
